<compile_context>
chip_gen: v6e
topology: v6e:2x2x1
jax: 0.10.0
libtpu: 0.0.40
codegen_flags: <defaults>
</compile_context>

<pallas_src>
import jax
import jax.numpy as jnp
from jax.experimental import pallas as pl
from jax.experimental.pallas import tpu as pltpu


def cartpole_agent_kernel(w_ref, b_ref, x_ref, out_ref):
    """Folded affine map + softmax over actions, batch dense on (sublane, lane).

    w_ref  : SMEM (num_inputs, num_actions)   folded weights (scalars)
    b_ref  : SMEM (num_actions,)              folded bias (scalars)
    x_ref  : VMEM (num_inputs, TR, 128)       obs tile, batch on last two axes
    out_ref: VMEM (num_actions, TR, 128)      softmax probabilities
    """
    num_inputs = x_ref.shape[0]
    num_actions = out_ref.shape[0]

    if num_actions == 2:
        # softmax([l0, l1]) == [1 - sigmoid(d), sigmoid(d)] with d = l1 - l0.
        # One exp per vector, numerically-stable form, rows sum to exactly 1.
        d = x_ref[0, :, :] * (w_ref[0, 1] - w_ref[0, 0]) + (b_ref[1] - b_ref[0])
        for k in range(1, num_inputs):
            d = d + x_ref[k, :, :] * (w_ref[k, 1] - w_ref[k, 0])
        e = jnp.exp(-jnp.abs(d))          # single EUP push, e in (0, 1]
        inv = 1.0 / (1.0 + e)             # exact reciprocal (mem-bound anyway)
        p1 = jnp.where(d >= 0, inv, e * inv)   # stable sigmoid(d)
        out_ref[1, :, :] = p1.astype(out_ref.dtype)
        out_ref[0, :, :] = (1.0 - p1).astype(out_ref.dtype)
    else:
        # General small-N path: dense per-action slabs + stable softmax.
        logits = []
        for n in range(num_actions):
            acc = x_ref[0, :, :] * w_ref[0, n] + b_ref[n]
            for k in range(1, num_inputs):
                acc = acc + x_ref[k, :, :] * w_ref[k, n]
            logits.append(acc)                          # (TR, 128)
        m = logits[0]
        for n in range(1, num_actions):
            m = jnp.maximum(m, logits[n])
        exps = [jnp.exp(l - m) for l in logits]
        denom = exps[0]
        for n in range(1, num_actions):
            denom = denom + exps[n]
        inv = 1.0 / denom
        for n in range(num_actions):
            out_ref[n, :, :] = (exps[n] * inv).astype(out_ref.dtype)


def cartpole_agent_forward(obs, params, *, tile_b=131072):
    """obs: (B, num_inputs) float-like; params: dict w1,b1,w2,b2,w3,b3.

    Weights stored as (in_features, out_features), biases as (1, out)."""
    w1, b1, w2, b2, w3, b3 = (params["w1"], params["b1"], params["w2"],
                              params["b2"], params["w3"], params["b3"])
    batch = obs.shape[0]
    num_inputs = w1.shape[0]
    num_actions = w3.shape[1]

    # --- Exact algebraic fold of the three bias-affine layers (no nonlinearity
    # between them in the reference module), done once in the wrapper. ---
    hp = jax.lax.Precision.HIGHEST
    w_fold = jnp.dot(jnp.dot(w1, w2, precision=hp), w3, precision=hp)
    b_fold = (jnp.dot(jnp.dot(b1, w2, precision=hp) + b2, w3, precision=hp)
              + b3).reshape(num_actions)

    # --- Tiling: big, balanced, 1024-aligned batch tiles (8-aligned sublanes
    # for the (tb//128, 128) slabs); single tile may be any multiple of 128. ---
    lanes, sub = 128, 8
    b_128 = pl.cdiv(batch, lanes) * lanes
    n_tiles = max(1, pl.cdiv(b_128, tile_b))
    if n_tiles == 1:
        tb = b_128
    else:
        tb = pl.cdiv(pl.cdiv(b_128, n_tiles), lanes * sub) * lanes * sub
    b_pad = pl.cdiv(b_128, tb) * tb
    rows = b_pad // lanes
    tr = tb // lanes

    # --- Lane-dense layout: batch on (sublane, lane); pad value 0 is finite so
    # padded columns produce harmless (sliced-off) probabilities. ---
    obs_t = jnp.transpose(obs).astype(jnp.float32)          # (num_inputs, B)
    obs_t = jnp.pad(obs_t, ((0, 0), (0, b_pad - batch)))    # (num_inputs, b_pad)
    obs_3d = obs_t.reshape(num_inputs, rows, lanes)

    cost = pl.CostEstimate(
        flops=(2 * num_inputs + 8) * num_actions * b_pad,
        transcendentals=(1 if num_actions == 2 else num_actions) * b_pad,
        bytes_accessed=(num_inputs + num_actions) * 4 * b_pad)

    out_3d = pl.pallas_call(
        cartpole_agent_kernel,
        out_shape=jax.ShapeDtypeStruct((num_actions, rows, lanes), jnp.float32),
        grid=(b_pad // tb,),
        in_specs=[
            pl.BlockSpec(memory_space=pltpu.MemorySpace.SMEM),    # folded W
            pl.BlockSpec(memory_space=pltpu.MemorySpace.SMEM),    # folded b
            pl.BlockSpec((num_inputs, tr, lanes), lambda i: (0, i, 0)),
        ],
        out_specs=pl.BlockSpec((num_actions, tr, lanes), lambda i: (0, i, 0)),
        compiler_params=pltpu.CompilerParams(
            dimension_semantics=("parallel",),
            vmem_limit_bytes=48 * 1024 * 1024),
        cost_estimate=cost,
    )(w_fold, b_fold, obs_3d)

    # Back to the PyTorch layout (B, num_actions), dropping batch padding.
    out = out_3d.reshape(num_actions, b_pad)
    return jnp.transpose(out[:, :batch])


def init_params(key, num_inputs, num_actions, hidden_size):
    """nn.Linear-style U(-1/sqrt(fan_in), 1/sqrt(fan_in)) init.

    Weights stored as (in_features, out_features)."""
    keys = jax.random.split(key, 6)

    def linear(kw, kb, fan_in, fan_out):
        bound = 1.0 / jnp.sqrt(jnp.float32(fan_in))
        w = jax.random.uniform(kw, (fan_in, fan_out), jnp.float32, -bound, bound)
        b = jax.random.uniform(kb, (1, fan_out), jnp.float32, -bound, bound)
        return w, b

    w1, b1 = linear(keys[0], keys[1], num_inputs, hidden_size)
    w2, b2 = linear(keys[2], keys[3], hidden_size, hidden_size)
    w3, b3 = linear(keys[4], keys[5], hidden_size, num_actions)
    return {"w1": w1, "b1": b1, "w2": w2, "b2": b2, "w3": w3, "b3": b3}


def reference_forward(obs, params):
    """Unfolded three-layer reference (matches the PyTorch module exactly)."""
    hp = jax.lax.Precision.HIGHEST
    h = jnp.dot(obs, params["w1"], precision=hp) + params["b1"]
    h = jnp.dot(h, params["w2"], precision=hp) + params["b2"]
    logits = jnp.dot(h, params["w3"], precision=hp) + params["b3"]
    return jax.nn.softmax(logits, axis=1)


if __name__ == "__main__":
    # CartPole-like sizes: 4 observation dims, 2 actions, hidden=32.
    num_inputs, num_actions, hidden_size = 4, 2, 32

    key = jax.random.PRNGKey(0)
    k_obs, k_obs_big, k_params = jax.random.split(key, 3)
    params = init_params(k_params, num_inputs, num_actions, hidden_size)

    forward = jax.jit(cartpole_agent_forward, static_argnames=("tile_b",))

    # Residual error: exact-but-reassociated layer fold + exp implementation.
    TOL = 1e-4

    # Small, CartPole-like batch (single tile padded to 128 lanes).
    obs = jax.random.normal(k_obs, (8, num_inputs), jnp.float32)
    probs = jax.block_until_ready(forward(obs, params))
    ref = reference_forward(obs, params)
    assert probs.shape == (8, num_actions)
    assert jnp.allclose(probs, ref, atol=TOL, rtol=0), "mismatch vs reference (B=8)"
    assert jnp.allclose(jnp.sum(probs, axis=1), 1.0, atol=1e-5)

    # Larger batch with a small tile override to exercise the multi-tile,
    # balanced-tile, pipelined grid path (b_128=5120 -> 5 tiles of 1024 cols).
    obs_big = jax.random.normal(k_obs_big, (5000, num_inputs), jnp.float32)
    probs_big = jax.block_until_ready(forward(obs_big, params, tile_b=1024))
    ref_big = reference_forward(obs_big, params)
    assert probs_big.shape == (5000, num_actions)
    assert jnp.allclose(probs_big, ref_big, atol=TOL, rtol=0), "mismatch (B=5000)"
    assert jnp.allclose(jnp.sum(probs_big, axis=1), 1.0, atol=1e-5)

    print("KERNEL_OK")
</pallas_src>

<mosaic_0001>
module attributes {stable_mosaic.version = 11 : i64} {
  func.func @cartpole_agent_kernel(%arg0: i32, %arg1: memref<4x2xf32, #tpu.memory_space<smem>>, %arg2: memref<2xf32, #tpu.memory_space<smem>>, %arg3: memref<4x1x128xf32, #tpu.memory_space<vmem>>, %arg4: memref<2x1x128xf32, #tpu.memory_space<vmem>>) attributes {dimension_semantics = [#tpu.dimension_semantics<parallel>], iteration_bounds = array<i64: 1>, scalar_prefetch = 0 : i64, scratch_operands = 0 : i64, tpu.core_type = #tpu.core_type<tc>, window_params = [{transform_indices = @transform_0, window_bounds = array<i64: 4, 2>}, {transform_indices = @transform_1, window_bounds = array<i64: 2>}, {transform_indices = @transform_2, window_bounds = array<i64: 4, 1, 128>}, {transform_indices = @transform_3, window_bounds = array<i64: 2, 1, 128>}]} {
    %c0 = arith.constant 0 : index
    %c0_0 = arith.constant 0 : index
    %c0_1 = arith.constant 0 : index
    %0 = vector.load %arg3[%c0, %c0_0, %c0_1] : memref<4x1x128xf32, #tpu.memory_space<vmem>>, vector<1x1x128xf32>
    %1 = vector.shape_cast %0 : vector<1x1x128xf32> to vector<1x128xf32>
    %c0_2 = arith.constant 0 : index
    %c1 = arith.constant 1 : index
    %2 = memref.load %arg1[%c0_2, %c1] : memref<4x2xf32, #tpu.memory_space<smem>>
    %c0_3 = arith.constant 0 : index
    %c0_4 = arith.constant 0 : index
    %3 = memref.load %arg1[%c0_3, %c0_4] : memref<4x2xf32, #tpu.memory_space<smem>>
    %4 = arith.subf %2, %3 : f32
    %5 = vector.broadcast %4 : f32 to vector<1x128xf32>
    %6 = arith.mulf %1, %5 : vector<1x128xf32>
    %c1_5 = arith.constant 1 : index
    %7 = memref.load %arg2[%c1_5] : memref<2xf32, #tpu.memory_space<smem>>
    %c0_6 = arith.constant 0 : index
    %8 = memref.load %arg2[%c0_6] : memref<2xf32, #tpu.memory_space<smem>>
    %9 = arith.subf %7, %8 : f32
    %10 = vector.broadcast %9 : f32 to vector<1x128xf32>
    %11 = arith.addf %6, %10 : vector<1x128xf32>
    %c1_7 = arith.constant 1 : index
    %c0_8 = arith.constant 0 : index
    %c0_9 = arith.constant 0 : index
    %12 = vector.load %arg3[%c1_7, %c0_8, %c0_9] : memref<4x1x128xf32, #tpu.memory_space<vmem>>, vector<1x1x128xf32>
    %13 = vector.shape_cast %12 : vector<1x1x128xf32> to vector<1x128xf32>
    %c1_10 = arith.constant 1 : index
    %c1_11 = arith.constant 1 : index
    %14 = memref.load %arg1[%c1_10, %c1_11] : memref<4x2xf32, #tpu.memory_space<smem>>
    %c1_12 = arith.constant 1 : index
    %c0_13 = arith.constant 0 : index
    %15 = memref.load %arg1[%c1_12, %c0_13] : memref<4x2xf32, #tpu.memory_space<smem>>
    %16 = arith.subf %14, %15 : f32
    %17 = vector.broadcast %16 : f32 to vector<1x128xf32>
    %18 = arith.mulf %13, %17 : vector<1x128xf32>
    %19 = arith.addf %11, %18 : vector<1x128xf32>
    %c2 = arith.constant 2 : index
    %c0_14 = arith.constant 0 : index
    %c0_15 = arith.constant 0 : index
    %20 = vector.load %arg3[%c2, %c0_14, %c0_15] : memref<4x1x128xf32, #tpu.memory_space<vmem>>, vector<1x1x128xf32>
    %21 = vector.shape_cast %20 : vector<1x1x128xf32> to vector<1x128xf32>
    %c2_16 = arith.constant 2 : index
    %c1_17 = arith.constant 1 : index
    %22 = memref.load %arg1[%c2_16, %c1_17] : memref<4x2xf32, #tpu.memory_space<smem>>
    %c2_18 = arith.constant 2 : index
    %c0_19 = arith.constant 0 : index
    %23 = memref.load %arg1[%c2_18, %c0_19] : memref<4x2xf32, #tpu.memory_space<smem>>
    %24 = arith.subf %22, %23 : f32
    %25 = vector.broadcast %24 : f32 to vector<1x128xf32>
    %26 = arith.mulf %21, %25 : vector<1x128xf32>
    %27 = arith.addf %19, %26 : vector<1x128xf32>
    %c3 = arith.constant 3 : index
    %c0_20 = arith.constant 0 : index
    %c0_21 = arith.constant 0 : index
    %28 = vector.load %arg3[%c3, %c0_20, %c0_21] : memref<4x1x128xf32, #tpu.memory_space<vmem>>, vector<1x1x128xf32>
    %29 = vector.shape_cast %28 : vector<1x1x128xf32> to vector<1x128xf32>
    %c3_22 = arith.constant 3 : index
    %c1_23 = arith.constant 1 : index
    %30 = memref.load %arg1[%c3_22, %c1_23] : memref<4x2xf32, #tpu.memory_space<smem>>
    %c3_24 = arith.constant 3 : index
    %c0_25 = arith.constant 0 : index
    %31 = memref.load %arg1[%c3_24, %c0_25] : memref<4x2xf32, #tpu.memory_space<smem>>
    %32 = arith.subf %30, %31 : f32
    %33 = vector.broadcast %32 : f32 to vector<1x128xf32>
    %34 = arith.mulf %29, %33 : vector<1x128xf32>
    %35 = arith.addf %27, %34 : vector<1x128xf32>
    %36 = math.absf %35 : vector<1x128xf32>
    %cst = arith.constant 0.000000e+00 : f32
    %37 = vector.broadcast %cst : f32 to vector<1x128xf32>
    %38 = arith.subf %37, %36 : vector<1x128xf32>
    %39 = math.exp %38 : vector<1x128xf32>
    %cst_26 = arith.constant 1.000000e+00 : f32
    %40 = vector.broadcast %cst_26 : f32 to vector<1x128xf32>
    %41 = arith.addf %40, %39 : vector<1x128xf32>
    %cst_27 = arith.constant 1.000000e+00 : f32
    %42 = vector.broadcast %cst_27 : f32 to vector<1x128xf32>
    %43 = arith.divf %42, %41 : vector<1x128xf32>
    %cst_28 = arith.constant 0.000000e+00 : f32
    %44 = vector.broadcast %cst_28 : f32 to vector<1x128xf32>
    %45 = arith.cmpf oge, %35, %44 : vector<1x128xf32>
    %46 = arith.mulf %39, %43 : vector<1x128xf32>
    %47 = arith.select %45, %43, %46 : vector<1x128xi1>, vector<1x128xf32>
    %c1_29 = arith.constant 1 : index
    %c0_30 = arith.constant 0 : index
    %c0_31 = arith.constant 0 : index
    %48 = vector.load %arg4[%c1_29, %c0_30, %c0_31] : memref<2x1x128xf32, #tpu.memory_space<vmem>>, vector<1x1x128xf32>
    %49 = vector.shape_cast %48 : vector<1x1x128xf32> to vector<1x128xf32>
    %50 = vector.shape_cast %47 : vector<1x128xf32> to vector<1x1x128xf32>
    tpu.vector_store %arg4[%c1_29, %c0_30, %c0_31], %50 {strides = array<i32>} : memref<2x1x128xf32, #tpu.memory_space<vmem>>, vector<1x1x128xf32>,
    %cst_32 = arith.constant 1.000000e+00 : f32
    %51 = vector.broadcast %cst_32 : f32 to vector<1x128xf32>
    %52 = arith.subf %51, %47 : vector<1x128xf32>
    %c0_33 = arith.constant 0 : index
    %c0_34 = arith.constant 0 : index
    %c0_35 = arith.constant 0 : index
    %53 = vector.load %arg4[%c0_33, %c0_34, %c0_35] : memref<2x1x128xf32, #tpu.memory_space<vmem>>, vector<1x1x128xf32>
    %54 = vector.shape_cast %53 : vector<1x1x128xf32> to vector<1x128xf32>
    %55 = vector.shape_cast %52 : vector<1x128xf32> to vector<1x1x128xf32>
    tpu.vector_store %arg4[%c0_33, %c0_34, %c0_35], %55 {strides = array<i32>} : memref<2x1x128xf32, #tpu.memory_space<vmem>>, vector<1x1x128xf32>,
    return
  }
  func.func @transform_0(%arg0: i32) -> (i32, i32) {
    %c0_i32 = arith.constant 0 : i32
    %c0_i32_0 = arith.constant 0 : i32
    %c0_i32_1 = arith.constant 0 : i32
    return %c0_i32, %c0_i32_0 : i32, i32
  }
  func.func @transform_1(%arg0: i32) -> i32 {
    %c0_i32 = arith.constant 0 : i32
    %c0_i32_0 = arith.constant 0 : i32
    return %c0_i32 : i32
  }
  func.func @transform_2(%arg0: i32) -> (i32, i32, i32) {
    %c0_i32 = arith.constant 0 : i32
    %c0_i32_0 = arith.constant 0 : i32
    %c0_i32_1 = arith.constant 0 : i32
    return %c0_i32, %arg0, %c0_i32_0 : i32, i32, i32
  }
  func.func @transform_3(%arg0: i32) -> (i32, i32, i32) {
    %c0_i32 = arith.constant 0 : i32
    %c0_i32_0 = arith.constant 0 : i32
    %c0_i32_1 = arith.constant 0 : i32
    return %c0_i32, %arg0, %c0_i32_0 : i32, i32, i32
  }
}

</mosaic_0001>

<bundles_post_ra>
// kernel: cartpole_agent_forward.1
= control target key start
LH: loop header
LB: loop body
LE: loop exit
PB: predicated region body
PF: predicated region fallthrough
CT: control target
= control target key end

     0   :  { %8 = vsyncpa [#allocation3], 0  ;;  %s186_s0 = inlined_call_operand.vmem [shape: f32[4,2], index: 0, kind: input, shape index: {}]   ;;  %s187_s1 = inlined_call_operand.vmem [shape: f32[2], index: 1, kind: input, shape index: {}]   ;;  %s188_s2 = inlined_call_operand.vmem [shape: f32[4,1,128], index: 2, kind: input, shape index: {}]   ;;  %s189_s3 = inlined_call_operand.vmem [shape: f32[2,1,128], index: 3, kind: output, shape index: {}]  }
   0x1   :  { %s16_s14 = sshll.u32 %s186_s0, 4  ;;  %s17_s14 = int_to_ptr.vmem [resolvable:$true] %s16_s14 }
   0x2   :  { %9 = vsyncpa [#allocation5], 0  ;;  %s26_s17 = sshll.u32 %s187_s1, 4  ;;  %s112_s18 = scalar_lea.vmem %s17_s14, 64  ;;  %s27_s17 = int_to_ptr.vmem [resolvable:$true] %s26_s17 }
   0x3   :  { %p113_p0 = scmp.ne.s32.totalorder %s17_s14, %s112_s18  ;;  %p117_p1 = scmp.lt.s32.totalorder %s17_s14, %s17_s14 }
   0x4   :  { %p118_p2 = scmp.lt.s32.totalorder %s112_s18, %s112_s18 }
   0x6   :  { %p119_p3 = por %p118_p2, %p117_p1 }
   0x8   :  { %p120_p4 = pnand %p119_p3, %p113_p0 }
   0xa   :  { %123 = shalt.err (!%p120_p4)
}
   0xb   :  { %s140_s19 = smov [#allocation2]   ;;  %s124_s20 = scalar_lea.vmem %s27_s17, 16 }
   0xc   :  { %19 = dma.vmem_to_smem %s17_s14, 64, %s140_s19, [#allocation3]  }
   0xd   :  { %p125_p5 = scmp.ne.s32.totalorder %s27_s17, %s124_s20  ;;  %p129_p6 = scmp.lt.s32.totalorder %s27_s17, %s27_s17 }
   0xe   :  { %p130_p7 = scmp.lt.s32.totalorder %s124_s20, %s124_s20 }
  0x10   :  { %p131_p8 = por %p130_p7, %p129_p6 }
  0x12   :  { %p132_p9 = pnand %p131_p8, %p125_p5 }
  0x14   :  { %135 = shalt.err (!%p132_p9)
}
  0x15   :  { %s141_s0 = smov [#allocation4]  }
  0x16   :  { %29 = dma.vmem_to_smem %s27_s17, 16, %s141_s0, [#allocation5]  }
  0x17   :  { %136 = dma.done.wait [#allocation3], 64  }
  0x18   :  { %137 = vsyncadd [#allocation3], 4294967232 }
  0x19   :  { %138 = dma.done.wait [#allocation5], 16  }
  0x1a   :  { %139 = vsyncadd [#allocation5], 4294967280 }
  0x1b   :  { %38 = sfence }
  0x1c   :  { %s94_s1 = sld [smem:[#allocation2 + $0x1]]  ;;  %v39_v0 = vld [vmem:[%s188_s2] sm:$0x1]  ;;  %v96_v4 = vld [vmem:[%s188_s2 + $0x1] sm:$0x1] }
  0x1d   :  { %s41_s21 = sld [smem:[#allocation2]]  ;;  %v99_v8 = vld [vmem:[%s188_s2 + $0x2] sm:$0x1]  ;;  %v102_v12 = vld [vmem:[%s188_s2 + $0x3] sm:$0x1] }
  0x1e   :  { %s95_s22 = sld [smem:[#allocation4 + $0x1]] }
  0x1f   :  { %s46_s23 = sld [smem:[#allocation4]] }
  0x20   :  { %s97_s24 = sld [smem:[#allocation2 + $0x81]] }
  0x21   :  { %s98_s25 = sld [smem:[#allocation2 + $0x80]] }
  0x22   :  { %s100_s26 = sld [smem:[#allocation2 + $0x101]] }
  0x23   :  { %s42_s29 = ssub.f32 %s94_s1, %s41_s21 }
  0x24   :  { %s101_s30 = sld [smem:[#allocation2 + $0x100]] }
  0x25   :  { %v43_v1 = vstv %s42_s29  ;;  %s47_s4 = ssub.f32 %s95_s22, %s46_s23 }
  0x26   :  { %v44_v2 = vmul.f32 %v43_v1, %v39_v0  ;;  %s103_s5 = sld [smem:[#allocation2 + $0x181]] }
  0x27   :  { %v48_v3 = vstv %s47_s4  ;;  %s54_s8 = ssub.f32 %s97_s24, %s98_s25 }
  0x28   :  { %v49_v5 = vadd.f32 %v48_v3, %v44_v2  ;;  %s104_s9 = sld [smem:[#allocation2 + $0x180]] }
  0x29   :  { %v55_v6 = vstv %s54_s8 }
  0x2a   :  { %v56_v7 = vmul.f32 %v96_v4, %v55_v6  ;;  %s62_s12 = ssub.f32 %s100_s26, %s101_s30 }
  0x2c   :  { %v57_v9 = vadd.f32 %v56_v7, %v49_v5  ;;  %v63_v10 = vstv %s62_s12 }
  0x2d   :  { %v64_v11 = vmul.f32 %v99_v8, %v63_v10 }
  0x2e   :  { %s70_s15 = ssub.f32 %s103_s5, %s104_s9 }
  0x2f   :  { %v65_v13 = vadd.f32 %v64_v11, %v57_v9 }
  0x30   :  { %v71_v14 = vstv %s70_s15 }
  0x31   :  { %v72_v15 = vmul.f32 %v102_v12, %v71_v14 }
  0x33   :  { %v73_v16 = vadd.f32 %v72_v15, %v65_v13 }
  0x35   :  { %v74_v17 = vand.u32 2147483647, %v73_v16  ;;  %vm81_vm0 = vcmp.ge.f32.partialorder %v73_v16, 0.0 }
  0x37   :  { %v75_v18 = vsub.f32 0.0, %v74_v17 }
  0x39   :  { %v76_v19 = vmul.f32 1.442695, %v75_v18 }
  0x3b   :  { %108 = vpow2.f32 %v76_v19 }
  0x48   :  { %v109_v20 = vpop.eup %108 }
  0x49   :  { %v78_v21 = vadd.f32 1.0, %v109_v20 }
  0x4b   :  { %110 = vrcp.f32 %v78_v21 }
  0x58   :  { %v111_v22 = vpop.eup %110 }
  0x59   :  { %v82_v23 = vmul.f32 %v111_v22, %v109_v20 }
  0x5b   :  { %v83_v24 = vsel %vm81_vm0, %v111_v22, %v82_v23 }
  0x5c   :  { %105 = vst [vmem:[%s189_s3 + $0x1] sm:$0x1] %v83_v24  ;;  %v86_v25 = vsub.f32 1.0, %v83_v24 }
  0x5e   :  { %87 = vst [vmem:[%s189_s3] sm:$0x1] %v86_v25 }
  0x5f   :  { %92 = vsyncpa [#allocation3], 1 }
  0x60   :  { %93 = vsyncpa [#allocation5], 1 }

</bundles_post_ra>
